<compile_context>
chip_gen: v6e
topology: v6e:2x2x1
jax: 0.10.0
libtpu: 0.0.40
codegen_flags: <defaults>
</compile_context>

<pallas_src>
import functools

import jax
import jax.numpy as jnp
from jax.experimental import pallas as pl
from jax.experimental.pallas import tpu as pltpu


def _mlp_kernel(x_ref, w1_ref, b1_ref, w2_ref, b2_ref, w3_ref, b3_ref, o_ref):
    # Fully fused forward on the current batch tile, resident in VMEM.
    # MXU matmuls accumulate in f32; sigmoid (EUP) runs in f32.
    x = x_ref[...]
    h = jnp.dot(x.astype(w1_ref.dtype), w1_ref[...],
                preferred_element_type=jnp.float32)
    h = jax.nn.sigmoid(h + b1_ref[...].astype(jnp.float32))
    h = jnp.dot(h.astype(w2_ref.dtype), w2_ref[...],
                preferred_element_type=jnp.float32)
    h = jax.nn.sigmoid(h + b2_ref[...].astype(jnp.float32))
    out = jnp.dot(h.astype(w3_ref.dtype), w3_ref[...],
                  preferred_element_type=jnp.float32)
    out = out + b3_ref[...].astype(jnp.float32)
    o_ref[...] = out.astype(o_ref.dtype)


def _round_up(x, m):
    return ((x + m - 1) // m) * m


@functools.partial(jax.jit, static_argnames=("block_batch",))
def neural_net_forward(x, w1, b1, w2, b2, w3, b3, *, block_batch=4096):
    n, d_in = x.shape
    h1 = w1.shape[1]
    h2 = w2.shape[1]
    d_out = w3.shape[1]

    # Batch tile: as large as block_batch, clamped (8-row aligned) for tiny batches.
    n_aligned = _round_up(max(n, 1), 8)
    block = max(8, _round_up(min(block_batch, n_aligned), 8))
    # Split big single-tile batches so the grid has >=2 steps (keeps both v7x TCs busy).
    if block >= n_aligned and n_aligned >= 2048:
        block = max(8, _round_up((n_aligned + 1) // 2, 8))

    grid = (pl.cdiv(n, block),)  # ragged last tile handled by Pallas (no HBM pad copy)

    # Explicit VMEM budget: every per-row buffer pads to 128 lanes in VMEM.
    # x/out are double-buffered, h1/h2 are f32 scratch; generous headroom, capped
    # below v7x's 64 MiB physical VMEM and above v5e's 16 MiB scoped default.
    lane = 128
    row_bytes = 4 * (_round_up(d_in, lane) + _round_up(h1, lane)
                     + _round_up(h2, lane) + _round_up(d_out, lane))
    vmem_limit = int(min(max(3 * block * row_bytes + (4 << 20), 32 << 20), 56 << 20))

    full = lambda i: (0, 0)  # weights/biases: same (whole) block every grid step

    out = pl.pallas_call(
        _mlp_kernel,
        out_shape=jax.ShapeDtypeStruct((n, d_out), x.dtype),
        grid_spec=pltpu.PrefetchScalarGridSpec(
            num_scalar_prefetch=0,
            grid=grid,
            in_specs=[
                pl.BlockSpec((block, d_in), lambda i: (i, 0)),
                pl.BlockSpec((d_in, h1), full),
                pl.BlockSpec((1, h1), full),
                pl.BlockSpec((h1, h2), full),
                pl.BlockSpec((1, h2), full),
                pl.BlockSpec((h2, d_out), full),
                pl.BlockSpec((1, d_out), full),
            ],
            out_specs=pl.BlockSpec((block, d_out), lambda i: (i, 0)),
        ),
        compiler_params=pltpu.CompilerParams(
            dimension_semantics=("parallel",),
            vmem_limit_bytes=vmem_limit,
        ),
    )(x, w1, b1, w2, b2, w3, b3)

    return out


def _reference(x, w1, b1, w2, b2, w3, b3):
    f32 = jnp.float32
    h = jax.nn.sigmoid(x.astype(f32) @ w1.astype(f32) + b1.astype(f32))
    h = jax.nn.sigmoid(h @ w2.astype(f32) + b2.astype(f32))
    return h @ w3.astype(f32) + b3.astype(f32)


if __name__ == "__main__":
    # Shapes consistent with the module: NeuralNet(input=64, h1=32, h2=32, output=10)
    D_IN, H1, H2, D_OUT = 64, 32, 32, 10

    key = jax.random.PRNGKey(0)
    kx, k1, k2, k3, kb1, kb2, kb3 = jax.random.split(key, 7)

    # Deterministic parameter init (Kaiming-uniform-ish scale like nn.Linear default).
    def init_linear(kw, kb, fan_in, fan_out):
        bound = 1.0 / jnp.sqrt(fan_in)
        w = jax.random.uniform(kw, (fan_in, fan_out), jnp.float32, -bound, bound)
        b = jax.random.uniform(kb, (1, fan_out), jnp.float32, -bound, bound)
        return w, b

    w1, b1 = init_linear(k1, kb1, D_IN, H1)
    w2, b2 = init_linear(k2, kb2, H1, H2)
    w3, b3 = init_linear(k3, kb3, H2, D_OUT)

    # Test 1: tiny batch (tile clamps to 8 rows, single-step grid), f32.
    x_small = jax.random.normal(kx, (8, D_IN), dtype=jnp.float32)
    out_small = jax.block_until_ready(
        neural_net_forward(x_small, w1, b1, w2, b2, w3, b3))
    ref_small = _reference(x_small, w1, b1, w2, b2, w3, b3)
    assert out_small.shape == (8, D_OUT)
    assert jnp.allclose(out_small, ref_small, atol=1e-5, rtol=1e-5), "small-batch mismatch"

    # Test 2: non-multiple batch (ragged last tile: padded reads + masked store, no
    # HBM pad/slice copies), 2-step parallel grid.
    x_big = jax.random.normal(kx, (300, D_IN), dtype=jnp.float32)
    out_big = jax.block_until_ready(
        neural_net_forward(x_big, w1, b1, w2, b2, w3, b3, block_batch=256))
    ref_big = _reference(x_big, w1, b1, w2, b2, w3, b3)
    assert out_big.shape == (300, D_OUT)
    assert jnp.allclose(out_big, ref_big, atol=1e-5, rtol=1e-5), "ragged-batch mismatch"

    # Test 3: bf16 inputs/weights in HBM (v6e/v7x fast path) with f32 accumulate and
    # f32 sigmoid inside the kernel; compare against f32 reference on the same
    # bf16-rounded params with loosened tolerances.
    bf16 = jnp.bfloat16
    x_bf = jax.random.normal(kx, (128, D_IN), dtype=jnp.float32).astype(bf16)
    params_bf = [p.astype(bf16) for p in (w1, b1, w2, b2, w3, b3)]
    out_bf = jax.block_until_ready(neural_net_forward(x_bf, *params_bf))
    ref_bf = _reference(x_bf, *params_bf)
    assert out_bf.shape == (128, D_OUT)
    assert jnp.allclose(out_bf.astype(jnp.float32), ref_bf, atol=5e-2, rtol=5e-2), \
        "bf16-path mismatch"

    print("KERNEL_OK")
</pallas_src>

<mosaic_0001>
module attributes {stable_mosaic.version = 11 : i64} {
  func.func @_mlp_kernel(%arg0: i32, %arg1: memref<8x64xf32, #tpu.memory_space<vmem>>, %arg2: memref<64x32xf32, #tpu.memory_space<vmem>>, %arg3: memref<1x32xf32, #tpu.memory_space<vmem>>, %arg4: memref<32x32xf32, #tpu.memory_space<vmem>>, %arg5: memref<1x32xf32, #tpu.memory_space<vmem>>, %arg6: memref<32x10xf32, #tpu.memory_space<vmem>>, %arg7: memref<1x10xf32, #tpu.memory_space<vmem>>, %arg8: memref<8x10xf32, #tpu.memory_space<vmem>>) attributes {dimension_semantics = [#tpu.dimension_semantics<parallel>], iteration_bounds = array<i64: 1>, scalar_prefetch = 0 : i64, scratch_operands = 0 : i64, tpu.core_type = #tpu.core_type<tc>, window_params = [{transform_indices = @transform_0, window_bounds = array<i64: 8, 64>}, {pipeline_mode = #tpu.pipeline_mode<synchronous>, transform_indices = @transform_1, window_bounds = array<i64: 64, 32>}, {pipeline_mode = #tpu.pipeline_mode<synchronous>, transform_indices = @transform_2, window_bounds = array<i64: 1, 32>}, {pipeline_mode = #tpu.pipeline_mode<synchronous>, transform_indices = @transform_3, window_bounds = array<i64: 32, 32>}, {pipeline_mode = #tpu.pipeline_mode<synchronous>, transform_indices = @transform_4, window_bounds = array<i64: 1, 32>}, {pipeline_mode = #tpu.pipeline_mode<synchronous>, transform_indices = @transform_5, window_bounds = array<i64: 32, 10>}, {pipeline_mode = #tpu.pipeline_mode<synchronous>, transform_indices = @transform_6, window_bounds = array<i64: 1, 10>}, {transform_indices = @transform_7, window_bounds = array<i64: 8, 10>}]} {
    %c0 = arith.constant 0 : index
    %c0_0 = arith.constant 0 : index
    %0 = vector.load %arg1[%c0, %c0_0] : memref<8x64xf32, #tpu.memory_space<vmem>>, vector<8x64xf32>
    %c0_1 = arith.constant 0 : index
    %c0_2 = arith.constant 0 : index
    %1 = vector.load %arg2[%c0_1, %c0_2] : memref<64x32xf32, #tpu.memory_space<vmem>>, vector<64x32xf32>
    %cst = arith.constant dense<0.000000e+00> : vector<8x32xf32>
    %2 = tpu.matmul %0, %1, %cst {dimension_numbers = #tpu.dot_dimension_numbers<[1], [0], [0], [1], [0, 0, 1, 1], [], []>} : vector<8x64xf32>, vector<64x32xf32>, vector<8x32xf32> -> vector<8x32xf32>
    %c0_3 = arith.constant 0 : index
    %c0_4 = arith.constant 0 : index
    %3 = vector.load %arg3[%c0_3, %c0_4] : memref<1x32xf32, #tpu.memory_space<vmem>>, vector<1x32xf32>
    %4 = vector.broadcast %3 : vector<1x32xf32> to vector<8x32xf32>
    %5 = arith.addf %2, %4 : vector<8x32xf32>
    %6 = arith.negf %5 : vector<8x32xf32>
    %7 = math.exp %6 : vector<8x32xf32>
    %cst_5 = arith.constant 1.000000e+00 : f32
    %8 = vector.broadcast %cst_5 : f32 to vector<8x32xf32>
    %9 = arith.addf %8, %7 : vector<8x32xf32>
    %10 = arith.divf %8, %9 : vector<8x32xf32>
    %c0_6 = arith.constant 0 : index
    %c0_7 = arith.constant 0 : index
    %11 = vector.load %arg4[%c0_6, %c0_7] : memref<32x32xf32, #tpu.memory_space<vmem>>, vector<32x32xf32>
    %cst_8 = arith.constant dense<0.000000e+00> : vector<8x32xf32>
    %12 = tpu.matmul %10, %11, %cst_8 {dimension_numbers = #tpu.dot_dimension_numbers<[1], [0], [0], [1], [0, 0, 1, 1], [], []>} : vector<8x32xf32>, vector<32x32xf32>, vector<8x32xf32> -> vector<8x32xf32>
    %c0_9 = arith.constant 0 : index
    %c0_10 = arith.constant 0 : index
    %13 = vector.load %arg5[%c0_9, %c0_10] : memref<1x32xf32, #tpu.memory_space<vmem>>, vector<1x32xf32>
    %14 = vector.broadcast %13 : vector<1x32xf32> to vector<8x32xf32>
    %15 = arith.addf %12, %14 : vector<8x32xf32>
    %16 = arith.negf %15 : vector<8x32xf32>
    %17 = math.exp %16 : vector<8x32xf32>
    %cst_11 = arith.constant 1.000000e+00 : f32
    %18 = vector.broadcast %cst_11 : f32 to vector<8x32xf32>
    %19 = arith.addf %18, %17 : vector<8x32xf32>
    %20 = arith.divf %18, %19 : vector<8x32xf32>
    %c0_12 = arith.constant 0 : index
    %c0_13 = arith.constant 0 : index
    %21 = vector.load %arg6[%c0_12, %c0_13] : memref<32x10xf32, #tpu.memory_space<vmem>>, vector<32x10xf32>
    %cst_14 = arith.constant dense<0.000000e+00> : vector<8x10xf32>
    %22 = tpu.matmul %20, %21, %cst_14 {dimension_numbers = #tpu.dot_dimension_numbers<[1], [0], [0], [1], [0, 0, 1, 1], [], []>} : vector<8x32xf32>, vector<32x10xf32>, vector<8x10xf32> -> vector<8x10xf32>
    %c0_15 = arith.constant 0 : index
    %c0_16 = arith.constant 0 : index
    %23 = vector.load %arg7[%c0_15, %c0_16] : memref<1x10xf32, #tpu.memory_space<vmem>>, vector<1x10xf32>
    %24 = vector.broadcast %23 : vector<1x10xf32> to vector<8x10xf32>
    %25 = arith.addf %22, %24 : vector<8x10xf32>
    %c0_17 = arith.constant 0 : index
    %c0_18 = arith.constant 0 : index
    %26 = vector.load %arg8[%c0_17, %c0_18] : memref<8x10xf32, #tpu.memory_space<vmem>>, vector<8x10xf32>
    tpu.vector_store %arg8[%c0_17, %c0_18], %25 {strides = array<i32>} : memref<8x10xf32, #tpu.memory_space<vmem>>, vector<8x10xf32>,
    return
  }
  func.func @transform_0(%arg0: i32) -> (i32, i32) {
    %c0_i32 = arith.constant 0 : i32
    %c0_i32_0 = arith.constant 0 : i32
    return %arg0, %c0_i32 : i32, i32
  }
  func.func @transform_1(%arg0: i32) -> (i32, i32) {
    %c0_i32 = arith.constant 0 : i32
    %c0_i32_0 = arith.constant 0 : i32
    %c0_i32_1 = arith.constant 0 : i32
    return %c0_i32, %c0_i32_0 : i32, i32
  }
  func.func @transform_2(%arg0: i32) -> (i32, i32) {
    %c0_i32 = arith.constant 0 : i32
    %c0_i32_0 = arith.constant 0 : i32
    %c0_i32_1 = arith.constant 0 : i32
    return %c0_i32, %c0_i32_0 : i32, i32
  }
  func.func @transform_3(%arg0: i32) -> (i32, i32) {
    %c0_i32 = arith.constant 0 : i32
    %c0_i32_0 = arith.constant 0 : i32
    %c0_i32_1 = arith.constant 0 : i32
    return %c0_i32, %c0_i32_0 : i32, i32
  }
  func.func @transform_4(%arg0: i32) -> (i32, i32) {
    %c0_i32 = arith.constant 0 : i32
    %c0_i32_0 = arith.constant 0 : i32
    %c0_i32_1 = arith.constant 0 : i32
    return %c0_i32, %c0_i32_0 : i32, i32
  }
  func.func @transform_5(%arg0: i32) -> (i32, i32) {
    %c0_i32 = arith.constant 0 : i32
    %c0_i32_0 = arith.constant 0 : i32
    %c0_i32_1 = arith.constant 0 : i32
    return %c0_i32, %c0_i32_0 : i32, i32
  }
  func.func @transform_6(%arg0: i32) -> (i32, i32) {
    %c0_i32 = arith.constant 0 : i32
    %c0_i32_0 = arith.constant 0 : i32
    %c0_i32_1 = arith.constant 0 : i32
    return %c0_i32, %c0_i32_0 : i32, i32
  }
  func.func @transform_7(%arg0: i32) -> (i32, i32) {
    %c0_i32 = arith.constant 0 : i32
    %c0_i32_0 = arith.constant 0 : i32
    return %arg0, %c0_i32 : i32, i32
  }
}

</mosaic_0001>

<bundles_post_ra>
// kernel: neural_net_forward.1
= control target key start
LH: loop header
LB: loop body
LE: loop exit
PB: predicated region body
PF: predicated region fallthrough
CT: control target
= control target key end

     0   :  { %v415_v1 = vmov 0.0   ;;  %vm416_vm0 = vmmov 0   ;;  %s545_s0 = inlined_call_operand.vmem [shape: f32[8,64], index: 0, kind: input, shape index: {}]   ;;  %s546_s1 = inlined_call_operand.vmem [shape: f32[64,32], index: 1, kind: input, shape index: {}]   ;;  %s547_s2 = inlined_call_operand.vmem [shape: f32[1,32], index: 2, kind: input, shape index: {}]   ;;  %s548_s3 = inlined_call_operand.vmem [shape: f32[32,32], index: 3, kind: input, shape index: {}]   ;;  %s549_s4 = inlined_call_operand.vmem [shape: f32[1,32], index: 4, kind: input, shape index: {}]   ;;  %s550_s5 = inlined_call_operand.vmem [shape: f32[32,10], index: 5, kind: input, shape index: {}]   ;;  %s551_s6 = inlined_call_operand.vmem [shape: f32[1,10], index: 6, kind: input, shape index: {}]   ;;  %s552_s7 = inlined_call_operand.hbm [shape: f32[8,10], index: 7, kind: output, shape index: {}]  }
   0x1   :  { %v35_v0 = vld [vmem:[%s546_s1 + $0x38] sm:$0xff]  ;;  %341 = vmatprep.subr.mxu0 %v415_v1  ;;  %v34_v2 = vld [vmem:[%s546_s1 + $0x30] sm:$0xff]  ;;  %357 = vmatprep.mubr.msk.f32.mxu0 %vm416_vm0, %v415_v1  ;;  %v33_v3 = vld [vmem:[%s546_s1 + $0x28] sm:$0xff] }
   0x2   :  { %342 = vmatpush3.msra.mxu0 %v35_v0  ;;  %360 = vmatprep.subr.mxu1 %v415_v1 }
   0x3   :  { %343 = vmatprep.subr.mxu0 %v415_v1  ;;  %368 = vmatprep.mubr.msk.f32.mxu1 %vm416_vm0, %v415_v1 }
   0x4   :  { %12 = vsyncpa [#allocation3], 0  ;;  %344 = vmatpush3.msra.mxu0 %v34_v2  ;;  %v32_v4 = vld [vmem:[%s546_s1 + $0x20] sm:$0xff]  ;;  %v31_v5 = vld [vmem:[%s546_s1 + $0x18] sm:$0xff]  ;;  %vm43_vm1 = vcmask 523264   ;;  %vm134_vm2 = vcmask 261120  }
   0x5   :  { %345 = vmatprep.subr.mxu0 %v415_v1  ;;  %v30_v6 = vld [vmem:[%s546_s1 + $0x10] sm:$0xff]  ;;  %v29_v7 = vld [vmem:[%s546_s1 + $0x8] sm:$0xff]  ;;  %v28_v8 = vld [vmem:[%s546_s1] sm:$0xff]  ;;  %s417_s13 = smov [#allocation2]   ;;  %vm298_vm3 = vcmask 80896  }
   0x6   :  { %346 = vmatpush3.msra.mxu0 %v33_v3  ;;  %v27_v9 = vld [vmem:[%s545_s0] sm:$0xff]  ;;  %v126_v10 = vld [vmem:[%s548_s3 + $0x18] sm:$0xff]  ;;  %v125_v11 = vld [vmem:[%s548_s3 + $0x10] sm:$0xff]  ;;  %s306_s14 = sshll.u32 %s417_s13, 4  ;;  %s307_s14 = int_to_ptr.vmem [resolvable:$true] %s306_s14 }
   0x7   :  { %347 = vmatprep.subr.mxu0 %v415_v1  ;;  %361 = vmatpush3.msra.mxu1 %v126_v10  ;;  %v124_v12 = vld [vmem:[%s548_s3 + $0x8] sm:$0xff]  ;;  %v123_v13 = vld [vmem:[%s548_s3] sm:$0xff]  ;;  %v217_v22 = vld [vmem:[%s550_s5 + $0x18] sm:$0xff]  ;;  %p398_p1 = scmp.lt.s32.totalorder %s307_s14, %s307_s14 }
   0x8   :  { %348 = vmatpush3.msra.mxu0 %v32_v4  ;;  %362 = vmatprep.subr.mxu1 %v415_v1  ;;  %v314_v14 = vld [vmem:[%s547_s2] ss:$0 sm:$0xff]  ;;  %v216_v23 = vld [vmem:[%s550_s5 + $0x10] sm:$0xff]  ;;  %v215_v24 = vld [vmem:[%s550_s5 + $0x8] sm:$0xff] }
   0x9   :  { %349 = vmatprep.subr.mxu0 %v415_v1  ;;  %363 = vmatpush3.msra.mxu1 %v125_v11  ;;  %v214_v25 = vld [vmem:[%s550_s5] sm:$0xff] }
   0xa   :  { %350 = vmatpush3.msra.mxu0 %v31_v5  ;;  %364 = vmatprep.subr.mxu1 %v415_v1  ;;  %v317_v26 = vld [vmem:[%s549_s4] ss:$0 sm:$0xff]  ;;  %s393_s4 = scalar_lea.vmem %s307_s14, 128 }
   0xb   :  { %351 = vmatprep.subr.mxu0 %v415_v1  ;;  %365 = vmatpush3.msra.mxu1 %v124_v12  ;;  %v320_v34 = vld [vmem:[%s551_s6] ss:$0 sm:$0xff]  ;;  %p394_p0 = scmp.ne.s32.totalorder %s307_s14, %s393_s4  ;;  %p399_p2 = scmp.lt.s32.totalorder %s393_s4, %s393_s4 }
   0xc   :  { %352 = vmatpush3.msra.mxu0 %v30_v6  ;;  %366 = vmatprep.subr.mxu1 %v415_v1 }
   0xd   :  { %353 = vmatprep.subr.mxu0 %v415_v1  ;;  %367 = vmatpush3.msra.mxu1 %v123_v13  ;;  %p400_p3 = por %p399_p2, %p398_p1 }
   0xe   :  { %354 = vmatpush3.msra.mxu0 %v29_v7  ;;  %371 = vmatprep.subr.mxu1 %v415_v1 }
   0xf   :  { %355 = vmatprep.subr.mxu0 %v415_v1  ;;  %p401_p4 = pnand %p400_p3, %p394_p0 }
  0x10   :  { %356 = vmatpush3.msra.mxu0 %v28_v8 }
  0x11   :  { %358 = vmatmul.mubr.msk.f32.vlgmr.msra.gmra.mxu0 %vm43_vm1, %v27_v9 }
  0xd1   :  { %v113_v15 = vpop.f32.mrf.mxu0 }
  0xd2   :  { %v114_v16 = vadd.f32 %v314_v14, %v113_v15 }
  0xd3   :  { %v359_v17 = vpop.f32.mrf.mxu0 }
  0xd4   :  { %v316_v18 = vmul.f32 -1.442695, %v114_v16 }
  0xd6   :  { %385 = vpow2.f32 %v316_v18 }
  0xe3   :  { %v386_v19 = vpop.eup %385 }
  0xe4   :  { %v120_v20 = vadd.f32 1.0, %v386_v19 }
  0xe6   :  { %387 = vrcp.f32 %v120_v20 }
  0xf3   :  { %v388_v21 = vpop.eup %387 }
  0xf4   :  { %369 = vmatmul.mubr.msk.f32.vlgmr.msra.gmra.mxu1 %vm134_vm2, %v388_v21 }
  0xf5   :  { %379 = vmatprep.mubr.msk.f32.mxu1 %vm416_vm0, %v415_v1  ;;  %372 = vmatpush3.msra.mxu1 %v217_v22 }
  0xf6   :  { %373 = vmatprep.subr.mxu1 %v415_v1 }
  0xf7   :  { %374 = vmatpush3.msra.mxu1 %v216_v23 }
  0xf8   :  { %375 = vmatprep.subr.mxu1 %v415_v1 }
  0xf9   :  { %376 = vmatpush3.msra.mxu1 %v215_v24 }
  0xfa   :  { %377 = vmatprep.subr.mxu1 %v415_v1 }
  0xfb   :  { %378 = vmatpush3.msra.mxu1 %v214_v25 }
 0x1b4   :  { %v204_v27 = vpop.f32.mrf.mxu1 }
 0x1b5   :  { %v205_v28 = vadd.f32 %v317_v26, %v204_v27 }
 0x1b6   :  { %v370_v29 = vpop.f32.mrf.mxu1 }
 0x1b7   :  { %v319_v30 = vmul.f32 -1.442695, %v205_v28 }
 0x1b9   :  { %389 = vpow2.f32 %v319_v30 }
 0x1c6   :  { %v390_v31 = vpop.eup %389 }
 0x1c7   :  { %v211_v32 = vadd.f32 1.0, %v390_v31 }
 0x1c9   :  { %391 = vrcp.f32 %v211_v32 }
 0x1d6   :  { %v392_v33 = vpop.eup %391 }
 0x1d7   :  { %380 = vmatmul.mubr.msk.f32.vlgmr.msra.gmra.mxu1 %vm134_vm2, %v392_v33 }
 0x297   :  { %v294_v35 = vpop.f32.mrf.mxu1 }
 0x298   :  { %v295_v36 = vadd.f32 %v320_v34, %v294_v35 }
 0x299   :  { %v381_v37 = vpop.f32.mrf.mxu1 }
 0x29a   :  { %299 = vst.msk [vmem:[#allocation2] sm:$0xff] %vm298_vm3, %v295_v36 }
 0x29b   :  { %404 = shalt.err (!%p401_p4)
}
 0x29c   :  { %309 = dma.vmem_to_hbm [thread:$0]  %s307_s14, 128, %s552_s7, [#allocation3]  }
 0x29d   :  { %413 = dma.done.wait [#allocation3], 128  }
 0x29e   :  { %414 = vsyncadd [#allocation3], 4294967168 }
 0x29f   :  { %313 = vsyncpa [#allocation3], 1 }

</bundles_post_ra>
